<compile_context>
chip_gen: v5e
topology: v5e:2x2
jax: 0.10.0
libtpu: 0.0.40
codegen_flags: <defaults>
</compile_context>

<pallas_src>
import jax
import jax.numpy as jnp
from jax.experimental import pallas as pl
from jax.experimental.pallas import tpu as pltpu

HIDDEN = 64        # logical hidden width (nn.Linear(., 64))
HIDDEN_PAD = 128   # lane-dense hidden width
OUT_PAD = 128      # lane-dense output width
SUBLANE = 8


def _round_up(x, m):
    return (x + m - 1) // m * m


def _make_dqn_kernel(in_size, vpu_layer1):
    def kernel(x_ref, w1_ref, b1_ref, w2_ref, b2_ref, w3_ref, b3_ref, o_ref):
        x = x_ref[...]
        if vpu_layer1:
            # K is tiny (2 for MountainCar): do layer 1 as broadcast FMAs on the
            # VPU instead of pushing a nearly-empty systolic pass through the MXU.
            h1 = x[:, 0:1] * w1_ref[0:1, :]
            for k in range(1, in_size):
                h1 = h1 + x[:, k:k + 1] * w1_ref[k:k + 1, :]
            h1 = h1 + b1_ref[...]
        else:
            h1 = jnp.dot(x, w1_ref[...], preferred_element_type=jnp.float32) + b1_ref[...]
        h1 = jnp.maximum(h1, 0.0)
        h2 = jnp.dot(h1, w2_ref[...], preferred_element_type=jnp.float32) + b2_ref[...]
        h2 = jnp.maximum(h2, 0.0)
        o_ref[...] = (
            jnp.dot(h2, w3_ref[...], preferred_element_type=jnp.float32) + b3_ref[...]
        )
    return kernel


def dqn_forward(x, params, *, batch_tile=512):
    """x: (B, input_size) f32. params: w1,b1,w2,b2,w3,b3 with W:(in,out), b:(1,out)."""
    w1, b1, w2, b2, w3, b3 = (params[k] for k in ("w1", "b1", "w2", "b2", "w3", "b3"))
    B, in_size = x.shape
    hidden = w1.shape[1]
    out_size = w3.shape[1]

    # ---- pad params to lane-dense widths (zeros are inert through ReLU/matmul) ----
    w1p = jnp.zeros((in_size, HIDDEN_PAD), jnp.float32).at[:, :hidden].set(w1)
    b1p = jnp.zeros((1, HIDDEN_PAD), jnp.float32).at[:, :hidden].set(b1)
    w2p = jnp.zeros((HIDDEN_PAD, HIDDEN_PAD), jnp.float32).at[:hidden, :hidden].set(w2)
    b2p = jnp.zeros((1, HIDDEN_PAD), jnp.float32).at[:, :hidden].set(b2)
    w3p = jnp.zeros((HIDDEN_PAD, OUT_PAD), jnp.float32).at[:hidden, :out_size].set(w3)
    b3p = jnp.zeros((1, OUT_PAD), jnp.float32).at[:, :out_size].set(b3)

    # ---- batch tiling: pad B up to a multiple of the tile ----
    tb = min(batch_tile, _round_up(B, SUBLANE))
    b_pad = _round_up(B, tb)
    if b_pad != B:
        x = jnp.zeros((b_pad, in_size), x.dtype).at[:B].set(x)
    n_tiles = b_pad // tb

    full = lambda a: pl.BlockSpec(a.shape, lambda i: (0, 0))  # VMEM-resident weights
    kernel = _make_dqn_kernel(in_size, vpu_layer1=(in_size <= 8))

    flops = 2 * b_pad * (in_size * HIDDEN_PAD + HIDDEN_PAD * HIDDEN_PAD + HIDDEN_PAD * OUT_PAD)
    bytes_accessed = 4 * (
        b_pad * (in_size + OUT_PAD)
        + w1p.size + b1p.size + w2p.size + b2p.size + w3p.size + b3p.size
    )
    cost = pl.CostEstimate(flops=flops, transcendentals=0, bytes_accessed=bytes_accessed)

    out_padded = pl.pallas_call(
        kernel,
        out_shape=jax.ShapeDtypeStruct((b_pad, OUT_PAD), jnp.float32),
        grid=(n_tiles,),
        in_specs=[
            pl.BlockSpec((tb, in_size), lambda i: (i, 0)),   # streamed batch tile
            full(w1p), full(b1p), full(w2p), full(b2p), full(w3p), full(b3p),
        ],
        out_specs=pl.BlockSpec((tb, OUT_PAD), lambda i: (i, 0)),  # lane-dense store
        compiler_params=pltpu.CompilerParams(
            dimension_semantics=("parallel",),
        ),
        cost_estimate=cost,
    )(x, w1p, b1p, w2p, b2p, w3p, b3p)

    return out_padded[:B, :out_size]


def init_params(key, input_size, output_size, hidden=HIDDEN):
    """Deterministic init mirroring nn.Linear shapes (stored transposed: (in, out))."""
    ks = jax.random.split(key, 6)

    def lin(kw, kb, fan_in, fan_out):
        bound = 1.0 / (fan_in ** 0.5)
        w = jax.random.uniform(kw, (fan_in, fan_out), jnp.float32, -bound, bound)
        b = jax.random.uniform(kb, (1, fan_out), jnp.float32, -bound, bound)
        return w, b

    w1, b1 = lin(ks[0], ks[1], input_size, hidden)
    w2, b2 = lin(ks[2], ks[3], hidden, hidden)
    w3, b3 = lin(ks[4], ks[5], hidden, output_size)
    return {"w1": w1, "b1": b1, "w2": w2, "b2": b2, "w3": w3, "b3": b3}


def dqn_reference(x, p):
    h1 = jnp.maximum(x @ p["w1"] + p["b1"], 0.0)
    h2 = jnp.maximum(h1 @ p["w2"] + p["b2"], 0.0)
    return h2 @ p["w3"] + p["b3"]


if __name__ == "__main__":
    # MountainCar-style DQN: observation dim 2, action dim 3.
    INPUT_SIZE, OUTPUT_SIZE = 2, 3
    key = jax.random.PRNGKey(0)
    kx_small, kx_large, kp = jax.random.split(key, 3)
    params = init_params(kp, INPUT_SIZE, OUTPUT_SIZE)

    # Small batch (single grid step, ragged B handled by padding).
    B = 8
    x = jax.random.normal(kx_small, (B, INPUT_SIZE), jnp.float32)
    out = dqn_forward(x, params)
    jax.block_until_ready(out)
    ref = dqn_reference(x, params)
    assert out.shape == (B, OUTPUT_SIZE)
    assert jnp.allclose(out, ref, atol=1e-5, rtol=1e-5)

    # Larger batch exercising the batch grid (2 tiles of 512, "parallel" axis).
    B2 = 1024
    x2 = jax.random.normal(kx_large, (B2, INPUT_SIZE), jnp.float32)
    out2 = dqn_forward(x2, params)
    jax.block_until_ready(out2)
    ref2 = dqn_reference(x2, params)
    assert out2.shape == (B2, OUTPUT_SIZE)
    assert jnp.allclose(out2, ref2, atol=1e-5, rtol=1e-5)

    print("KERNEL_OK")
</pallas_src>

<mosaic_0001>
module attributes {stable_mosaic.version = 11 : i64} {
  func.func @kernel(%arg0: i32, %arg1: memref<8x2xf32, #tpu.memory_space<vmem>>, %arg2: memref<2x128xf32, #tpu.memory_space<vmem>>, %arg3: memref<1x128xf32, #tpu.memory_space<vmem>>, %arg4: memref<128x128xf32, #tpu.memory_space<vmem>>, %arg5: memref<1x128xf32, #tpu.memory_space<vmem>>, %arg6: memref<128x128xf32, #tpu.memory_space<vmem>>, %arg7: memref<1x128xf32, #tpu.memory_space<vmem>>, %arg8: memref<8x128xf32, #tpu.memory_space<vmem>>) attributes {dimension_semantics = [#tpu.dimension_semantics<parallel>], iteration_bounds = array<i64: 1>, scalar_prefetch = 0 : i64, scratch_operands = 0 : i64, tpu.core_type = #tpu.core_type<tc>, window_params = [{transform_indices = @transform_0, window_bounds = array<i64: 8, 2>}, {pipeline_mode = #tpu.pipeline_mode<synchronous>, transform_indices = @transform_1, window_bounds = array<i64: 2, 128>}, {pipeline_mode = #tpu.pipeline_mode<synchronous>, transform_indices = @transform_2, window_bounds = array<i64: 1, 128>}, {pipeline_mode = #tpu.pipeline_mode<synchronous>, transform_indices = @transform_3, window_bounds = array<i64: 128, 128>}, {pipeline_mode = #tpu.pipeline_mode<synchronous>, transform_indices = @transform_4, window_bounds = array<i64: 1, 128>}, {pipeline_mode = #tpu.pipeline_mode<synchronous>, transform_indices = @transform_5, window_bounds = array<i64: 128, 128>}, {pipeline_mode = #tpu.pipeline_mode<synchronous>, transform_indices = @transform_6, window_bounds = array<i64: 1, 128>}, {transform_indices = @transform_7, window_bounds = array<i64: 8, 128>}]} {
    %c0 = arith.constant 0 : index
    %c0_0 = arith.constant 0 : index
    %0 = vector.load %arg1[%c0, %c0_0] : memref<8x2xf32, #tpu.memory_space<vmem>>, vector<8x2xf32>
    %1 = vector.extract_strided_slice %0 {offsets = [0, 0], sizes = [8, 1], strides = [1, 1]} : vector<8x2xf32> to vector<8x1xf32>
    %c0_1 = arith.constant 0 : index
    %c0_2 = arith.constant 0 : index
    %2 = vector.load %arg2[%c0_1, %c0_2] : memref<2x128xf32, #tpu.memory_space<vmem>>, vector<1x128xf32>
    %3 = vector.broadcast %1 : vector<8x1xf32> to vector<8x128xf32>
    %4 = vector.broadcast %2 : vector<1x128xf32> to vector<8x128xf32>
    %5 = arith.mulf %3, %4 : vector<8x128xf32>
    %6 = vector.extract_strided_slice %0 {offsets = [0, 1], sizes = [8, 1], strides = [1, 1]} : vector<8x2xf32> to vector<8x1xf32>
    %c1 = arith.constant 1 : index
    %c0_3 = arith.constant 0 : index
    %7 = vector.load %arg2[%c1, %c0_3] : memref<2x128xf32, #tpu.memory_space<vmem>>, vector<1x128xf32>
    %8 = vector.broadcast %6 : vector<8x1xf32> to vector<8x128xf32>
    %9 = vector.broadcast %7 : vector<1x128xf32> to vector<8x128xf32>
    %10 = arith.mulf %8, %9 : vector<8x128xf32>
    %11 = arith.addf %5, %10 : vector<8x128xf32>
    %c0_4 = arith.constant 0 : index
    %c0_5 = arith.constant 0 : index
    %12 = vector.load %arg3[%c0_4, %c0_5] : memref<1x128xf32, #tpu.memory_space<vmem>>, vector<1x128xf32>
    %13 = vector.broadcast %12 : vector<1x128xf32> to vector<8x128xf32>
    %14 = arith.addf %11, %13 : vector<8x128xf32>
    %cst = arith.constant 0.000000e+00 : f32
    %15 = vector.broadcast %cst : f32 to vector<8x128xf32>
    %16 = arith.maximumf %14, %15 : vector<8x128xf32>
    %c0_6 = arith.constant 0 : index
    %c0_7 = arith.constant 0 : index
    %17 = vector.load %arg4[%c0_6, %c0_7] : memref<128x128xf32, #tpu.memory_space<vmem>>, vector<128x128xf32>
    %cst_8 = arith.constant dense<0.000000e+00> : vector<8x128xf32>
    %18 = tpu.matmul %16, %17, %cst_8 {dimension_numbers = #tpu.dot_dimension_numbers<[1], [0], [0], [1], [0, 0, 1, 1], [], []>} : vector<8x128xf32>, vector<128x128xf32>, vector<8x128xf32> -> vector<8x128xf32>
    %c0_9 = arith.constant 0 : index
    %c0_10 = arith.constant 0 : index
    %19 = vector.load %arg5[%c0_9, %c0_10] : memref<1x128xf32, #tpu.memory_space<vmem>>, vector<1x128xf32>
    %20 = vector.broadcast %19 : vector<1x128xf32> to vector<8x128xf32>
    %21 = arith.addf %18, %20 : vector<8x128xf32>
    %cst_11 = arith.constant 0.000000e+00 : f32
    %22 = vector.broadcast %cst_11 : f32 to vector<8x128xf32>
    %23 = arith.maximumf %21, %22 : vector<8x128xf32>
    %c0_12 = arith.constant 0 : index
    %c0_13 = arith.constant 0 : index
    %24 = vector.load %arg6[%c0_12, %c0_13] : memref<128x128xf32, #tpu.memory_space<vmem>>, vector<128x128xf32>
    %cst_14 = arith.constant dense<0.000000e+00> : vector<8x128xf32>
    %25 = tpu.matmul %23, %24, %cst_14 {dimension_numbers = #tpu.dot_dimension_numbers<[1], [0], [0], [1], [0, 0, 1, 1], [], []>} : vector<8x128xf32>, vector<128x128xf32>, vector<8x128xf32> -> vector<8x128xf32>
    %c0_15 = arith.constant 0 : index
    %c0_16 = arith.constant 0 : index
    %26 = vector.load %arg7[%c0_15, %c0_16] : memref<1x128xf32, #tpu.memory_space<vmem>>, vector<1x128xf32>
    %27 = vector.broadcast %26 : vector<1x128xf32> to vector<8x128xf32>
    %28 = arith.addf %25, %27 : vector<8x128xf32>
    %c0_17 = arith.constant 0 : index
    %c0_18 = arith.constant 0 : index
    %29 = vector.load %arg8[%c0_17, %c0_18] : memref<8x128xf32, #tpu.memory_space<vmem>>, vector<8x128xf32>
    tpu.vector_store %arg8[%c0_17, %c0_18], %28 {strides = array<i32>} : memref<8x128xf32, #tpu.memory_space<vmem>>, vector<8x128xf32>,
    return
  }
  func.func @transform_0(%arg0: i32) -> (i32, i32) {
    %c0_i32 = arith.constant 0 : i32
    %c0_i32_0 = arith.constant 0 : i32
    return %arg0, %c0_i32 : i32, i32
  }
  func.func @transform_1(%arg0: i32) -> (i32, i32) {
    %c0_i32 = arith.constant 0 : i32
    %c0_i32_0 = arith.constant 0 : i32
    %c0_i32_1 = arith.constant 0 : i32
    return %c0_i32, %c0_i32_0 : i32, i32
  }
  func.func @transform_2(%arg0: i32) -> (i32, i32) {
    %c0_i32 = arith.constant 0 : i32
    %c0_i32_0 = arith.constant 0 : i32
    %c0_i32_1 = arith.constant 0 : i32
    return %c0_i32, %c0_i32_0 : i32, i32
  }
  func.func @transform_3(%arg0: i32) -> (i32, i32) {
    %c0_i32 = arith.constant 0 : i32
    %c0_i32_0 = arith.constant 0 : i32
    %c0_i32_1 = arith.constant 0 : i32
    return %c0_i32, %c0_i32_0 : i32, i32
  }
  func.func @transform_4(%arg0: i32) -> (i32, i32) {
    %c0_i32 = arith.constant 0 : i32
    %c0_i32_0 = arith.constant 0 : i32
    %c0_i32_1 = arith.constant 0 : i32
    return %c0_i32, %c0_i32_0 : i32, i32
  }
  func.func @transform_5(%arg0: i32) -> (i32, i32) {
    %c0_i32 = arith.constant 0 : i32
    %c0_i32_0 = arith.constant 0 : i32
    %c0_i32_1 = arith.constant 0 : i32
    return %c0_i32, %c0_i32_0 : i32, i32
  }
  func.func @transform_6(%arg0: i32) -> (i32, i32) {
    %c0_i32 = arith.constant 0 : i32
    %c0_i32_0 = arith.constant 0 : i32
    %c0_i32_1 = arith.constant 0 : i32
    return %c0_i32, %c0_i32_0 : i32, i32
  }
  func.func @transform_7(%arg0: i32) -> (i32, i32) {
    %c0_i32 = arith.constant 0 : i32
    %c0_i32_0 = arith.constant 0 : i32
    return %arg0, %c0_i32 : i32, i32
  }
}

</mosaic_0001>

<bundles_post_ra>
// kernel: tpu_custom_call.1
= control target key start
LH: loop header
LB: loop body
LE: loop exit
PB: predicated region body
PF: predicated region fallthrough
CT: control target
= control target key end

     0   :  { %12 = vsyncpa [#allocation3], 0  ;;  %s348_s0 = inlined_call_operand.vmem [shape: f32[8,2], index: 0, kind: input, shape index: {}]   ;;  %s349_s1 = inlined_call_operand.vmem [shape: f32[2,128], index: 1, kind: input, shape index: {}]   ;;  %s350_s2 = inlined_call_operand.vmem [shape: f32[1,128], index: 2, kind: input, shape index: {}]   ;;  %s351_s3 = inlined_call_operand.hbm [shape: f32[128,128], index: 3, kind: input, shape index: {}]   ;;  %s352_s4 = inlined_call_operand.vmem [shape: f32[1,128], index: 4, kind: input, shape index: {}]   ;;  %s353_s5 = inlined_call_operand.hbm [shape: f32[128,128], index: 5, kind: input, shape index: {}]   ;;  %s354_s6 = inlined_call_operand.vmem [shape: f32[1,128], index: 6, kind: input, shape index: {}]   ;;  %s355_s7 = inlined_call_operand.hbm [shape: f32[8,128], index: 7, kind: output, shape index: {}]  }
   0x1   :  { %13 = vsyncpa [#allocation6], 0 }
   0x2   :  { %14 = vsyncpa [#allocation4], 0  ;;  %s25_s26 = sshll.u32 %s351_s3, 4  ;;  %s274_s27 = smov [#allocation2]   ;;  %s26_s26 = int_to_ptr.hbm [resolvable:$true] %s25_s26 }
   0x3   :  { %s27_s28 = sshll.u32 %s274_s27, 4  ;;  %s40_s8 = sshll.u32 %s353_s5, 4  ;;  %s28_s28 = int_to_ptr.vmem [resolvable:$true] %s27_s28  ;;  %s41_s8 = int_to_ptr.hbm [resolvable:$true] %s40_s8 }
   0x4   :  { %s275_s9 = smov 128   ;;  %s276_s10 = smov 8  }
   0x5   :  { %33 = dma.hbm_to_vmem [thread:$0]  %s26_s26, 2048, %s28_s28, [#allocation3], %s275_s9, %s275_s9, %s276_s10  }
   0x6   :  { %s277_s11 = smov [#allocation5]  }
   0x7   :  { %s42_s12 = sshll.u32 %s277_s11, 4  ;;  %s43_s12 = int_to_ptr.vmem [resolvable:$true] %s42_s12 }
   0x8   :  { %48 = dma.hbm_to_vmem [thread:$0]  %s41_s8, 2048, %s43_s12, [#allocation6], %s275_s9, %s275_s9, %s276_s10  }
   0x9   :  { %268 = dma.done.wait [#allocation3], 2048  }
   0xa   :  { %269 = vsyncadd [#allocation3], 4294965248 }
   0xb   :  { %270 = dma.done.wait [#allocation6], 2048  }
   0xc   :  { %271 = vsyncadd [#allocation6], 4294965248  ;;  %v278_v0 = vmov 0   ;;  %v59_v1 = vld [vmem:[%s348_s0] sm:$0xff]  ;;  %v97_v2 = vld [vmem:[#allocation2 + $0x78] sm:$0xff]  ;;  %v279_v8 = vmov 1  }
   0xd   :  { %189 = vset.pattern.permute.xlu0 %v278_v0  ;;  %v96_v3 = vld [vmem:[#allocation2 + $0x70] sm:$0xff]  ;;  %102 = vmatpush.msra.mxu0 %v97_v2  ;;  %v95_v4 = vld [vmem:[#allocation2 + $0x68] sm:$0xff]  ;;  %v94_v5 = vld [vmem:[#allocation2 + $0x60] sm:$0xff]  ;;  %s280_s20 = smov [#allocation7]   ;;  %s171_s24 = sshll.u32 %s355_s7, 4  ;;  %s172_s24 = int_to_ptr.hbm [resolvable:$true] %s171_s24 }
   0xe   :  { %63 = vperm.xlu0 %189, %v59_v1   ;;  %v93_v6 = vld [vmem:[#allocation2 + $0x58] sm:$0xff]  ;;  %v92_v7 = vld [vmem:[#allocation2 + $0x50] sm:$0xff]  ;;  %v91_v9 = vld [vmem:[#allocation2 + $0x48] sm:$0xff]  ;;  %s169_s21 = sshll.u32 %s280_s20, 4  ;;  %s170_s21 = int_to_ptr.vmem [resolvable:$true] %s169_s21 }
   0xf   :  { %103 = vmatpush.msra.mxu0 %v96_v3  ;;  %v90_v10 = vld [vmem:[#allocation2 + $0x40] sm:$0xff]  ;;  %v89_v11 = vld [vmem:[#allocation2 + $0x38] sm:$0xff]  ;;  %v88_v12 = vld [vmem:[#allocation2 + $0x30] sm:$0xff] }
  0x10   :  { %v87_v13 = vld [vmem:[#allocation2 + $0x28] sm:$0xff]  ;;  %v86_v14 = vld [vmem:[#allocation2 + $0x20] sm:$0xff]  ;;  %v85_v15 = vld [vmem:[#allocation2 + $0x18] sm:$0xff] }
  0x11   :  { %104 = vmatpush.msra.mxu0 %v95_v4  ;;  %v84_v16 = vld [vmem:[#allocation2 + $0x10] sm:$0xff]  ;;  %v83_v17 = vld [vmem:[#allocation2 + $0x8] sm:$0xff]  ;;  %v82_v18 = vld [vmem:[#allocation2] sm:$0xff] }
  0x12   :  { %v138_v19 = vld [vmem:[#allocation5 + $0x78] sm:$0xff]  ;;  %v137_v20 = vld [vmem:[#allocation5 + $0x70] sm:$0xff]  ;;  %v136_v21 = vld [vmem:[#allocation5 + $0x68] sm:$0xff] }
  0x13   :  { %105 = vmatpush.msra.mxu0 %v94_v5  ;;  %143 = vmatpush.msra.mxu1 %v138_v19  ;;  %v135_v22 = vld [vmem:[#allocation5 + $0x60] sm:$0xff]  ;;  %v134_v23 = vld [vmem:[#allocation5 + $0x58] sm:$0xff]  ;;  %v133_v24 = vld [vmem:[#allocation5 + $0x50] sm:$0xff] }
  0x14   :  { %v132_v25 = vld [vmem:[#allocation5 + $0x48] sm:$0xff]  ;;  %v131_v26 = vld [vmem:[#allocation5 + $0x40] sm:$0xff]  ;;  %v130_v28 = vld [vmem:[#allocation5 + $0x38] sm:$0xff] }
  0x15   :  { %106 = vmatpush.msra.mxu0 %v93_v6  ;;  %144 = vmatpush.msra.mxu1 %v137_v20  ;;  %v129_v29 = vld [vmem:[#allocation5 + $0x30] sm:$0xff]  ;;  %v128_v30 = vld [vmem:[#allocation5 + $0x28] sm:$0xff]  ;;  %v191_v31 = vld [vmem:[%s349_s1] ss:$0 sm:$0xff] }
  0x16   :  { %190 = vset.pattern.permute.xlu0 %v279_v8  ;;  %v192_v32 = vld [vmem:[%s349_s1 + $0x1] ss:$0 sm:$0xff]  ;;  %v126_v34 = vld [vmem:[#allocation5 + $0x18] sm:$0xff]  ;;  %v193_v38 = vld [vmem:[%s350_s2] ss:$0 sm:$0xff] }
  0x17   :  { %70 = vperm.xlu0 %190, %v59_v1   ;;  %107 = vmatpush.msra.mxu0 %v92_v7  ;;  %v127_v33 = vld [vmem:[#allocation5 + $0x20] sm:$0xff]  ;;  %v125_v42 = vld [vmem:[#allocation5 + $0x10] sm:$0xff]  ;;  %v124_v43 = vld [vmem:[#allocation5 + $0x8] sm:$0xff] }
  0x18   :  { %145 = vmatpush.msra.mxu1 %v136_v21  ;;  %v123_v44 = vld [vmem:[#allocation5] sm:$0xff] }
  0x19   :  { %108 = vmatpush.msra.mxu0 %v91_v9  ;;  %v194_v45 = vld [vmem:[%s352_s4] ss:$0 sm:$0xff] }
  0x1a   :  { %146 = vmatpush.msra.mxu1 %v135_v22  ;;  %v195_v49 = vld [vmem:[%s354_s6] ss:$0 sm:$0xff] }
  0x1b   :  { %109 = vmatpush.msra.mxu0 %v90_v10 }
  0x1c   :  { %147 = vmatpush.msra.mxu1 %v134_v23 }
  0x1d   :  { %110 = vmatpush.msra.mxu0 %v89_v11 }
  0x1e   :  { %148 = vmatpush.msra.mxu1 %v133_v24 }
  0x1f   :  { %111 = vmatpush.msra.mxu0 %v88_v12 }
  0x20   :  { %149 = vmatpush.msra.mxu1 %v132_v25 }
  0x21   :  { %112 = vmatpush.msra.mxu0 %v87_v13 }
  0x22   :  { %150 = vmatpush.msra.mxu1 %v131_v26 }
  0x23   :  { %113 = vmatpush.msra.mxu0 %v86_v14 }
  0x24   :  { %151 = vmatpush.msra.mxu1 %v130_v28 }
  0x25   :  { %114 = vmatpush.msra.mxu0 %v85_v15 }
  0x26   :  { %152 = vmatpush.msra.mxu1 %v129_v29 }
  0x27   :  { %115 = vmatpush.msra.mxu0 %v84_v16 }
  0x28   :  { %153 = vmatpush.msra.mxu1 %v128_v30 }
  0x29   :  { %116 = vmatpush.msra.mxu0 %v83_v17 }
  0x2a   :  { %154 = vmatpush.msra.mxu1 %v127_v33 }
  0x2b   :  { %117 = vmatpush.msra.mxu0 %v82_v18 }
  0x2c   :  { %155 = vmatpush.msra.mxu1 %v126_v34 }
  0x2e   :  { %156 = vmatpush.msra.mxu1 %v125_v42 }
  0x30   :  { %157 = vmatpush.msra.mxu1 %v124_v43 }
  0x32   :  { %158 = vmatpush.msra.mxu1 %v123_v44 }
  0x80   :  { %v64_v27 = vpop.permute.xlu0 %63 }
  0x81   :  { %v67_v36 = vmul.f32 %v191_v31, %v64_v27 }
  0x89   :  { %v71_v35 = vpop.permute.xlu0 %70 }
  0x8a   :  { %v74_v37 = vmul.f32 %v192_v32, %v71_v35 }
  0x8c   :  { %v75_v39 = vadd.f32 %v74_v37, %v67_v36 }
  0x8e   :  { %v80_v40 = vadd.f32 %v193_v38, %v75_v39 }
  0x90   :  { %v81_v41 = vmax.f32 %v80_v40, 0.0 }
  0x92   :  { %118 = vmatmul.f32.vlgmr.msra.gmra.mxu0 %v81_v41 }
 0x10f   :  { %v119_v46 = vpop.f32.mrf.mxu0 }
 0x110   :  { %v120_v47 = vadd.f32 %v194_v45, %v119_v46 }
 0x112   :  { %v122_v48 = vmax.f32 %v120_v47, 0.0 }
 0x114   :  { %159 = vmatmul.f32.vlgmr.msra.gmra.mxu1 %v122_v48 }
 0x191   :  { %v160_v50 = vpop.f32.mrf.mxu1 }
 0x192   :  { %v161_v51 = vadd.f32 %v195_v49, %v160_v50 }
 0x194   :  { %163 = vst [vmem:[#allocation7] sm:$0xff] %v161_v51 }
 0x195   :  { %174 = dma.vmem_to_hbm [thread:$0]  %s170_s21, 128, %s172_s24, [#allocation4]  }
 0x196   :  { %272 = dma.done.wait [#allocation4], 128  }
 0x197   :  { %273 = vsyncadd [#allocation4], 4294967168 }
 0x198   :  { %179 = vsyncpa [#allocation3], 1 }
 0x199   :  { %180 = vsyncpa [#allocation6], 1 }
 0x19a   :  { %181 = vsyncpa [#allocation4], 1 }

</bundles_post_ra>
